<compile_context>
chip_gen: v7x
topology: tpu7x:2x2x1
jax: 0.10.0
libtpu: 0.0.40
codegen_flags: <defaults>
</compile_context>

<pallas_src>
import math

import jax
import jax.numpy as jnp
from jax.experimental import pallas as pl
from jax.experimental.pallas import tpu as pltpu


def _round_up(x, m):
    return ((x + m - 1) // m) * m


# ----------------------------- fused Pallas kernel -------------------------------

def _mlp_kernel(x_ref, *refs):
    """refs = (w0, b0, w1, b1, ..., o_ref). Chains Linear(+Tanh) layers.

    All intermediates stay in vregs/VMEM; one MXU contraction per layer (K, N <= 128).
    Matmul operands use the weights' stored dtype (f32 or bf16); accumulation,
    bias-add and tanh are f32.
    """
    o_ref = refs[-1]
    wb = refs[:-1]
    num_layers = len(wb) // 2

    h = x_ref[...].astype(jnp.float32)
    for i in range(num_layers):
        w = wb[2 * i][...]
        b = wb[2 * i + 1][...]                       # (1, Dout) f32, broadcasts
        h = jnp.dot(h.astype(w.dtype), w, preferred_element_type=jnp.float32)
        h = h + b
        if i < num_layers - 1:                       # Tanh on hidden layers only
            h = jnp.tanh(h)
    o_ref[...] = h.astype(o_ref.dtype)


# ----------------------------- batch tiling policy -------------------------------

def _select_batch_tiling(B):
    """Pick (tile_b, padded_B).

    Goals (in order): no row pad / output slice when the batch tiles cleanly;
    512-2048 row tiles for large batches; >=2 grid steps when cheaply possible so
    ("parallel",) dimension semantics can use both v7x TensorCores.
    """
    if B <= 8:
        return max(B, 1), B                              # single full-extent tile
    for t in (2048, 1024, 512, 256):                     # exact divisor, >=2 steps
        if B % t == 0 and B // t >= 2:
            return t, B
    if B <= 2048:
        if B % 16 == 0:                                  # two sublane-aligned halves
            return B // 2, B
        return B, B                                      # single full-extent tile
    # Ragged large batch: 1024-row tiles + cheap row-only pad (lane-dense) + slice.
    return 1024, _round_up(B, 1024)


# ------------------------------- forward pass -------------------------------------

def _qnetwork_forward_impl(x, prepared_params):
    """x: (B, share_dim) f32. prepared_params: list of (W, b) in kernel layout
    (hidden dims padded to 128; first-in / last-out dims left at native width)."""
    B, d_in = x.shape
    d_out = prepared_params[-1][0].shape[1]              # == action_dim (unpadded)

    tile_b, padded_b = _select_batch_tiling(B)
    if padded_b != B:
        # Row-only pad (no lane pad): < tile_b extra rows of the narrow input.
        x_in = jnp.zeros((padded_b, d_in), x.dtype).at[:B].set(x)
    else:
        x_in = x

    in_specs = [pl.BlockSpec((tile_b, d_in), lambda i: (i, 0))]
    flat_wb = []
    for w, b in prepared_params:
        flat_wb.append(w)
        flat_wb.append(b)
        # Constant index maps -> weights/biases fetched once, resident for all tiles.
        in_specs.append(pl.BlockSpec(w.shape, lambda i: (0, 0)))
        in_specs.append(pl.BlockSpec(b.shape, lambda i: (0, 0)))

    out = pl.pallas_call(
        _mlp_kernel,
        out_shape=jax.ShapeDtypeStruct((padded_b, d_out), x.dtype),
        grid=(padded_b // tile_b,),
        in_specs=in_specs,
        out_specs=pl.BlockSpec((tile_b, d_out), lambda i: (i, 0)),
        compiler_params=pltpu.CompilerParams(
            dimension_semantics=("parallel",)),          # batch tiles independent
    )(x_in, *flat_wb)

    if padded_b != B:
        out = out[:B]
    return out


qnetwork_forward = jax.jit(_qnetwork_forward_impl)


# --------------------------- parameter setup --------------------------------------

def orthogonal_init(key, shape, gain):
    """Orthogonal init with gain (same semantics as nn.init.orthogonal_)."""
    out_dim, in_dim = shape                              # PyTorch Linear weight (out, in)
    n_rows, n_cols = (out_dim, in_dim) if out_dim >= in_dim else (in_dim, out_dim)
    a = jax.random.normal(key, (n_rows, n_cols), dtype=jnp.float32)
    q, r = jnp.linalg.qr(a)
    q = q * jnp.where(jnp.diag(r) >= 0, 1.0, -1.0)       # sign fix -> unique / uniform
    if out_dim < in_dim:
        q = q.T
    return gain * q[:out_dim, :in_dim]


def make_qnetwork_params(key, share_dim, action_dim, value_arch):
    """Returns list of (W (in,out), bias (1,out)) f32, unpadded kernel layout."""
    params = []
    last = share_dim
    dims = list(value_arch) + [action_dim]
    gains = [math.sqrt(2.0)] * len(value_arch) + [1.0]
    for cur, gain in zip(dims, gains):
        key, sub = jax.random.split(key)
        w_torch = orthogonal_init(sub, (cur, last), gain)     # (out, in)
        w = jnp.asarray(w_torch).T                            # (in, out)
        b = jnp.zeros((1, cur), dtype=jnp.float32)            # constant_(bias, 0.0)
        params.append((w, b))
        last = cur
    return params


def prepare_params_for_kernel(params, matmul_dtype=jnp.float32):
    """Pad ONLY hidden feature dims to 128 lanes (exact: pads are inert). The first
    layer's input dim and the last layer's output dim stay at native width so the
    HBM-facing x / output tensors are not lane-padded. Weights are cast to
    matmul_dtype (bf16 recommended on v6e/v7x); biases stay f32."""
    n = len(params)
    prepared = []
    for li, (w, b) in enumerate(params):
        din, dout = w.shape
        din_p = din if li == 0 else _round_up(din, 128)
        dout_p = dout if li == n - 1 else _round_up(dout, 128)
        w_p = jnp.zeros((din_p, dout_p), jnp.float32).at[:din, :dout].set(w)
        b_p = jnp.zeros((1, dout_p), jnp.float32).at[:, :dout].set(b)
        prepared.append((w_p.astype(matmul_dtype), b_p))
    return prepared


def reference_forward(x, params):
    """Plain-JAX reference with the exact nn.Module semantics (f32, high precision)."""
    h = x
    for li, (w, b) in enumerate(params):
        h = jnp.dot(h, w, precision=jax.lax.Precision.HIGHEST) + b
        if li < len(params) - 1:
            h = jnp.tanh(h)
    return h


# ------------------------------- driver --------------------------------------

if __name__ == "__main__":
    share_dim, action_dim = 32, 8
    value_arch = [64, 64]
    batch = 8

    key = jax.random.PRNGKey(0)
    kx, kp = jax.random.split(key)
    x = jax.random.normal(kx, (batch, share_dim), dtype=jnp.float32)

    params = make_qnetwork_params(kp, share_dim, action_dim, value_arch)
    ref = reference_forward(x, params)

    # f32 MXU-operand path (exact module semantics).
    p_f32 = prepare_params_for_kernel(params, matmul_dtype=jnp.float32)
    q_f32 = qnetwork_forward(x, p_f32)
    jax.block_until_ready(q_f32)
    assert q_f32.shape == (batch, action_dim)
    assert jnp.allclose(q_f32, ref, atol=1e-2), "f32 kernel mismatch vs reference"

    # bf16 MXU-operand path (v6e/v7x recommendation): f32 accumulate / bias / tanh,
    # expect ~1e-2 drift on Q-values -> loose sanity bound only.
    p_bf16 = prepare_params_for_kernel(params, matmul_dtype=jnp.bfloat16)
    q_bf16 = qnetwork_forward(x, p_bf16)
    jax.block_until_ready(q_bf16)
    assert q_bf16.shape == (batch, action_dim)
    assert jnp.allclose(q_bf16, ref, atol=1e-1), "bf16 kernel drifted too far from reference"

    # NOTE: at batch=8 the pallas_call fixed overhead dominates; the tiling /
    # bandwidth wins above only show up at realistic rollout batches (>= 4K rows),
    # which the same wrapper handles (512-2048 row tiles, >=2 parallel tiles on v7x).
    print("KERNEL_OK")
</pallas_src>

<mosaic_0001>
module attributes {stable_mosaic.version = 11 : i64} {
  func.func @_mlp_kernel(%arg0: i32, %arg1: memref<8x32xf32, #tpu.memory_space<vmem>>, %arg2: memref<32x128xf32, #tpu.memory_space<vmem>>, %arg3: memref<1x128xf32, #tpu.memory_space<vmem>>, %arg4: memref<128x128xf32, #tpu.memory_space<vmem>>, %arg5: memref<1x128xf32, #tpu.memory_space<vmem>>, %arg6: memref<128x8xf32, #tpu.memory_space<vmem>>, %arg7: memref<1x8xf32, #tpu.memory_space<vmem>>, %arg8: memref<8x8xf32, #tpu.memory_space<vmem>>) attributes {dimension_semantics = [#tpu.dimension_semantics<parallel>], iteration_bounds = array<i64: 1>, scalar_prefetch = 0 : i64, scratch_operands = 0 : i64, tpu.core_type = #tpu.core_type<tc>, window_params = [{transform_indices = @transform_0, window_bounds = array<i64: 8, 32>}, {pipeline_mode = #tpu.pipeline_mode<synchronous>, transform_indices = @transform_1, window_bounds = array<i64: 32, 128>}, {pipeline_mode = #tpu.pipeline_mode<synchronous>, transform_indices = @transform_2, window_bounds = array<i64: 1, 128>}, {pipeline_mode = #tpu.pipeline_mode<synchronous>, transform_indices = @transform_3, window_bounds = array<i64: 128, 128>}, {pipeline_mode = #tpu.pipeline_mode<synchronous>, transform_indices = @transform_4, window_bounds = array<i64: 1, 128>}, {pipeline_mode = #tpu.pipeline_mode<synchronous>, transform_indices = @transform_5, window_bounds = array<i64: 128, 8>}, {pipeline_mode = #tpu.pipeline_mode<synchronous>, transform_indices = @transform_6, window_bounds = array<i64: 1, 8>}, {transform_indices = @transform_7, window_bounds = array<i64: 8, 8>}]} {
    %c0 = arith.constant 0 : index
    %c0_0 = arith.constant 0 : index
    %0 = vector.load %arg1[%c0, %c0_0] : memref<8x32xf32, #tpu.memory_space<vmem>>, vector<8x32xf32>
    %c0_1 = arith.constant 0 : index
    %c0_2 = arith.constant 0 : index
    %1 = vector.load %arg2[%c0_1, %c0_2] : memref<32x128xf32, #tpu.memory_space<vmem>>, vector<32x128xf32>
    %c0_3 = arith.constant 0 : index
    %c0_4 = arith.constant 0 : index
    %2 = vector.load %arg3[%c0_3, %c0_4] : memref<1x128xf32, #tpu.memory_space<vmem>>, vector<1x128xf32>
    %cst = arith.constant dense<0.000000e+00> : vector<8x128xf32>
    %3 = tpu.matmul %0, %1, %cst {dimension_numbers = #tpu.dot_dimension_numbers<[1], [0], [0], [1], [0, 0, 1, 1], [], []>} : vector<8x32xf32>, vector<32x128xf32>, vector<8x128xf32> -> vector<8x128xf32>
    %4 = vector.broadcast %2 : vector<1x128xf32> to vector<8x128xf32>
    %5 = arith.addf %3, %4 : vector<8x128xf32>
    %6 = math.tanh %5 : vector<8x128xf32>
    %c0_5 = arith.constant 0 : index
    %c0_6 = arith.constant 0 : index
    %7 = vector.load %arg4[%c0_5, %c0_6] : memref<128x128xf32, #tpu.memory_space<vmem>>, vector<128x128xf32>
    %c0_7 = arith.constant 0 : index
    %c0_8 = arith.constant 0 : index
    %8 = vector.load %arg5[%c0_7, %c0_8] : memref<1x128xf32, #tpu.memory_space<vmem>>, vector<1x128xf32>
    %cst_9 = arith.constant dense<0.000000e+00> : vector<8x128xf32>
    %9 = tpu.matmul %6, %7, %cst_9 {dimension_numbers = #tpu.dot_dimension_numbers<[1], [0], [0], [1], [0, 0, 1, 1], [], []>} : vector<8x128xf32>, vector<128x128xf32>, vector<8x128xf32> -> vector<8x128xf32>
    %10 = vector.broadcast %8 : vector<1x128xf32> to vector<8x128xf32>
    %11 = arith.addf %9, %10 : vector<8x128xf32>
    %12 = math.tanh %11 : vector<8x128xf32>
    %c0_10 = arith.constant 0 : index
    %c0_11 = arith.constant 0 : index
    %13 = vector.load %arg6[%c0_10, %c0_11] : memref<128x8xf32, #tpu.memory_space<vmem>>, vector<128x8xf32>
    %c0_12 = arith.constant 0 : index
    %c0_13 = arith.constant 0 : index
    %14 = vector.load %arg7[%c0_12, %c0_13] : memref<1x8xf32, #tpu.memory_space<vmem>>, vector<1x8xf32>
    %cst_14 = arith.constant dense<0.000000e+00> : vector<8x8xf32>
    %15 = tpu.matmul %12, %13, %cst_14 {dimension_numbers = #tpu.dot_dimension_numbers<[1], [0], [0], [1], [0, 0, 1, 1], [], []>} : vector<8x128xf32>, vector<128x8xf32>, vector<8x8xf32> -> vector<8x8xf32>
    %16 = vector.broadcast %14 : vector<1x8xf32> to vector<8x8xf32>
    %17 = arith.addf %15, %16 : vector<8x8xf32>
    %c0_15 = arith.constant 0 : index
    %c0_16 = arith.constant 0 : index
    %18 = vector.load %arg8[%c0_15, %c0_16] : memref<8x8xf32, #tpu.memory_space<vmem>>, vector<8x8xf32>
    tpu.vector_store %arg8[%c0_15, %c0_16], %17 {strides = array<i32>} : memref<8x8xf32, #tpu.memory_space<vmem>>, vector<8x8xf32>,
    return
  }
  func.func @transform_0(%arg0: i32) -> (i32, i32) {
    %c0_i32 = arith.constant 0 : i32
    %c0_i32_0 = arith.constant 0 : i32
    return %arg0, %c0_i32 : i32, i32
  }
  func.func @transform_1(%arg0: i32) -> (i32, i32) {
    %c0_i32 = arith.constant 0 : i32
    %c0_i32_0 = arith.constant 0 : i32
    %c0_i32_1 = arith.constant 0 : i32
    return %c0_i32, %c0_i32_0 : i32, i32
  }
  func.func @transform_2(%arg0: i32) -> (i32, i32) {
    %c0_i32 = arith.constant 0 : i32
    %c0_i32_0 = arith.constant 0 : i32
    %c0_i32_1 = arith.constant 0 : i32
    return %c0_i32, %c0_i32_0 : i32, i32
  }
  func.func @transform_3(%arg0: i32) -> (i32, i32) {
    %c0_i32 = arith.constant 0 : i32
    %c0_i32_0 = arith.constant 0 : i32
    %c0_i32_1 = arith.constant 0 : i32
    return %c0_i32, %c0_i32_0 : i32, i32
  }
  func.func @transform_4(%arg0: i32) -> (i32, i32) {
    %c0_i32 = arith.constant 0 : i32
    %c0_i32_0 = arith.constant 0 : i32
    %c0_i32_1 = arith.constant 0 : i32
    return %c0_i32, %c0_i32_0 : i32, i32
  }
  func.func @transform_5(%arg0: i32) -> (i32, i32) {
    %c0_i32 = arith.constant 0 : i32
    %c0_i32_0 = arith.constant 0 : i32
    %c0_i32_1 = arith.constant 0 : i32
    return %c0_i32, %c0_i32_0 : i32, i32
  }
  func.func @transform_6(%arg0: i32) -> (i32, i32) {
    %c0_i32 = arith.constant 0 : i32
    %c0_i32_0 = arith.constant 0 : i32
    %c0_i32_1 = arith.constant 0 : i32
    return %c0_i32, %c0_i32_0 : i32, i32
  }
  func.func @transform_7(%arg0: i32) -> (i32, i32) {
    %c0_i32 = arith.constant 0 : i32
    %c0_i32_0 = arith.constant 0 : i32
    return %arg0, %c0_i32 : i32, i32
  }
}

</mosaic_0001>

<bundles_post_ra>
// kernel: _qnetwork_forward_impl.1
= control target key start
LH: loop header
LB: loop body
LE: loop exit
PB: predicated region body
PF: predicated region fallthrough
CT: control target
= control target key end

     0   :  { %12 = vsyncpa [#allocation3], 0  ;;  %s769_s0 = inlined_call_operand.vmem [shape: f32[8,32], index: 0, kind: input, shape index: {}]   ;;  %s770_s1 = inlined_call_operand.hbm [shape: f32[32,128], index: 1, kind: input, shape index: {}]   ;;  %s771_s2 = inlined_call_operand.vmem [shape: f32[1,128], index: 2, kind: input, shape index: {}]   ;;  %s772_s3 = inlined_call_operand.vmem [shape: f32[128,128], index: 3, kind: input, shape index: {}]   ;;  %s773_s4 = inlined_call_operand.vmem [shape: f32[1,128], index: 4, kind: input, shape index: {}]   ;;  %s774_s5 = inlined_call_operand.vmem [shape: f32[128,8], index: 5, kind: input, shape index: {}]   ;;  %s775_s6 = inlined_call_operand.vmem [shape: f32[1,8], index: 6, kind: input, shape index: {}]   ;;  %s776_s7 = inlined_call_operand.hbm [shape: f32[8,8], index: 7, kind: output, shape index: {}]  }
   0x1   :  { %13 = vsyncpa [#allocation4], 0  ;;  %s569_s24 = smov [#allocation2]   ;;  %s521_s28 = scalar_lea.hbm %s770_s1, 512 }
   0x2   :  { %s21_s25 = sshll.u32 %s569_s24, 4  ;;  %p522_p0 = scmp.ne.s32.totalorder %s770_s1, %s521_s28  ;;  %s22_s25 = int_to_ptr.vmem [resolvable:$true] %s21_s25 }
   0x3   :  { %p525_p1 = scmp.lt.u32.totalorder %s521_s28, %s770_s1 }
   0x5   :  { %p527_p2 = pnand %p525_p1, %p522_p0 }
   0x7   :  { %530 = shalt.err (!%p527_p2)
}
   0x8   :  { %s531_s10 = scalar_lea.vmem %s22_s25, 512  ;;  %p536_p4 = scmp.lt.s32.totalorder %s22_s25, %s22_s25 }
   0x9   :  { %p532_p3 = scmp.ne.s32.totalorder %s22_s25, %s531_s10  ;;  %p537_p5 = scmp.lt.s32.totalorder %s531_s10, %s531_s10 }
   0xb   :  { %p538_p6 = por %p537_p5, %p536_p4 }
   0xd   :  { %p539_p7 = pnand %p538_p6, %p532_p3 }
   0xf   :  { %542 = shalt.err (!%p539_p7)
}
  0x10   :  { %s570_s11 = smov 128   ;;  %s571_s12 = smov 8  }
  0x11   :  { %27 = dma.hbm_to_vmem [thread:$0]  %s770_s1, 512, %s22_s25, [#allocation3], %s570_s11, %s570_s11, %s571_s12  }
  0x12   :  { %565 = dma.done.wait [#allocation3], 512  }
  0x13   :  { %566 = vsyncadd [#allocation3], 4294966784  ;;  %v572_v0 = vmov 0.0|0.0   ;;  %vm573_vm0 = vmmov 0   ;;  %v574_v1 = vmov 0.0   ;;  %v42_v2 = vld [vmem:[#allocation2] sm:$0xff] }
  0x14   :  { %456 = vmatprep.subr.bf16.mxu0 %v572_v0  ;;  %383 = vmatprep.mubr.msk.f32.mxu0 %vm573_vm0, %v574_v1  ;;  %v43_v3 = vld [vmem:[#allocation2 + $0x8] sm:$0xff]  ;;  %v44_v4 = vld [vmem:[#allocation2 + $0x10] sm:$0xff]  ;;  %v45_v6 = vld [vmem:[#allocation2 + $0x18] sm:$0xff]  ;;  %vm53_vm1 = vcmask 261120   ;;  %vm315_vm2 = vcmask 64512  }
  0x15   :  { %462 = vmatprep.subr.bf16.mxu1 %v572_v0  ;;  %418 = vmatprep.mubr.msk.f32.mxu1 %vm573_vm0, %v574_v1  ;;  %v457_v5 = vpack.c.bf16 %v43_v3, %v42_v2  ;;  %v128_v7 = vld [vmem:[%s772_s3] sm:$0xff]  ;;  %v129_v8 = vld [vmem:[%s772_s3 + $0x8] sm:$0xff]  ;;  %v130_v9 = vld [vmem:[%s772_s3 + $0x10] sm:$0xff]  ;;  %v460_v11 = vpack.c.bf16 %v45_v6, %v44_v4 }
  0x16   :  { %v131_v10 = vld [vmem:[%s772_s3 + $0x18] sm:$0xff]  ;;  %v463_v12 = vpack.c.bf16 %v129_v8, %v128_v7  ;;  %v132_v14 = vld [vmem:[%s772_s3 + $0x20] sm:$0xff]  ;;  %v133_v15 = vld [vmem:[%s772_s3 + $0x28] sm:$0xff] }
  0x17   :  { %458 = vmatpush3.bf16.msra.mxu0 %v457_v5  ;;  %v466_v13 = vpack.c.bf16 %v131_v10, %v130_v9  ;;  %v41_v16 = vld [vmem:[%s769_s0] sm:$0xff]  ;;  %v469_v17 = vpack.c.bf16 %v133_v15, %v132_v14  ;;  %v134_v18 = vld [vmem:[%s772_s3 + $0x30] sm:$0xff]  ;;  %v135_v19 = vld [vmem:[%s772_s3 + $0x38] sm:$0xff] }
  0x18   :  { %459 = vmatprep.subr.bf16.mxu0 %v572_v0  ;;  %464 = vmatpush3.bf16.msra.mxu1 %v463_v12  ;;  %v472_v20 = vpack.c.bf16 %v135_v19, %v134_v18  ;;  %v136_v21 = vld [vmem:[%s772_s3 + $0x40] sm:$0xff]  ;;  %v137_v22 = vld [vmem:[%s772_s3 + $0x48] sm:$0xff]  ;;  %v138_v24 = vld [vmem:[%s772_s3 + $0x50] sm:$0xff] }
  0x19   :  { %465 = vmatprep.subr.bf16.mxu1 %v572_v0  ;;  %v475_v23 = vpack.c.bf16 %v137_v22, %v136_v21  ;;  %v139_v25 = vld [vmem:[%s772_s3 + $0x58] sm:$0xff]  ;;  %v140_v27 = vld [vmem:[%s772_s3 + $0x60] sm:$0xff]  ;;  %v141_v28 = vld [vmem:[%s772_s3 + $0x68] sm:$0xff] }
  0x1a   :  { %v478_v26 = vpack.c.bf16 %v139_v25, %v138_v24  ;;  %v481_v29 = vpack.c.bf16 %v141_v28, %v140_v27  ;;  %v142_v30 = vld [vmem:[%s772_s3 + $0x70] sm:$0xff]  ;;  %v143_v31 = vld [vmem:[%s772_s3 + $0x78] sm:$0xff]  ;;  %v222_v33 = vld [vmem:[%s774_s5] sm:$0xff] }
  0x1b   :  { %461 = vmatpush3.bf16.msra.mxu0 %v460_v11  ;;  %v484_v32 = vpack.c.bf16 %v143_v31, %v142_v30  ;;  %v223_v34 = vld [vmem:[%s774_s5 + $0x8] sm:$0xff]  ;;  %v224_v35 = vld [vmem:[%s774_s5 + $0x10] sm:$0xff]  ;;  %v225_v37 = vld [vmem:[%s774_s5 + $0x18] sm:$0xff] }
  0x1c   :  { %486 = vmatprep.subr.bf16.mxu0 %v572_v0  ;;  %467 = vmatpush3.bf16.msra.mxu1 %v466_v13  ;;  %v487_v36 = vpack.c.bf16 %v223_v34, %v222_v33  ;;  %v490_v38 = vpack.c.bf16 %v225_v37, %v224_v35  ;;  %v226_v39 = vld [vmem:[%s774_s5 + $0x20] sm:$0xff]  ;;  %v227_v40 = vld [vmem:[%s774_s5 + $0x28] sm:$0xff]  ;;  %v228_v42 = vld [vmem:[%s774_s5 + $0x30] sm:$0xff] }
  0x1d   :  { %468 = vmatprep.subr.bf16.mxu1 %v572_v0  ;;  %v493_v41 = vpack.c.bf16 %v227_v40, %v226_v39  ;;  %v229_v43 = vld [vmem:[%s774_s5 + $0x38] sm:$0xff]  ;;  %v230_v45 = vld [vmem:[%s774_s5 + $0x40] sm:$0xff]  ;;  %v231_v46 = vld [vmem:[%s774_s5 + $0x48] sm:$0xff] }
  0x1e   :  { %384 = vmatmul.mubr.msk.f32.vlgmr.msra.gmra.mrb[0].mxu0 %vm53_vm1, %v41_v16  ;;  %v496_v44 = vpack.c.bf16 %v229_v43, %v228_v42  ;;  %v499_v47 = vpack.c.bf16 %v231_v46, %v230_v45  ;;  %v332_v48 = vld [vmem:[%s771_s2] ss:$0 sm:$0xff]  ;;  %v232_v53 = vld [vmem:[%s774_s5 + $0x50] sm:$0xff]  ;;  %v233_v54 = vld [vmem:[%s774_s5 + $0x58] sm:$0xff] }
  0x1f   :  { %453 = vmatprep.mubr.msk.f32.mxu0 %vm573_vm0, %v574_v1  ;;  %488 = vmatpush3.bf16.msra.mxu0 %v487_v36  ;;  %v502_v55 = vpack.c.bf16 %v233_v54, %v232_v53  ;;  %v234_v56 = vld [vmem:[%s774_s5 + $0x60] sm:$0xff]  ;;  %v235_v57 = vld [vmem:[%s774_s5 + $0x68] sm:$0xff]  ;;  %v236_v59 = vld [vmem:[%s774_s5 + $0x70] sm:$0xff] }
  0x20   :  { %470 = vmatpush3.bf16.msra.mxu1 %v469_v17  ;;  %489 = vmatprep.subr.bf16.mxu0 %v572_v0  ;;  %v505_v58 = vpack.c.bf16 %v235_v57, %v234_v56  ;;  %v237_v60 = vld [vmem:[%s774_s5 + $0x78] sm:$0xff]  ;;  %v334_v62 = vld [vmem:[%s773_s4] ss:$0 sm:$0xff]  ;;  %s575_s5 = smov [#allocation5]  }
  0x21   :  { %471 = vmatprep.subr.bf16.mxu1 %v572_v0  ;;  %v508_v61 = vpack.c.bf16 %v237_v60, %v236_v59  ;;  %v335_v4 = vld [vmem:[%s775_s6] ss:$0 sm:$0xff]  ;;  %s323_s9 = sshll.u32 %s575_s5, 4  ;;  %s324_s9 = int_to_ptr.vmem [resolvable:$true] %s323_s9 }
  0x22   :  { %s543_s10 = scalar_lea.vmem %s324_s9, 128  ;;  %p548_p9 = scmp.lt.s32.totalorder %s324_s9, %s324_s9 }
  0x23   :  { %491 = vmatpush3.bf16.msra.mxu0 %v490_v38  ;;  %p544_p8 = scmp.ne.s32.totalorder %s324_s9, %s543_s10  ;;  %p549_p10 = scmp.lt.s32.totalorder %s543_s10, %s543_s10 }
  0x24   :  { %473 = vmatpush3.bf16.msra.mxu1 %v472_v20  ;;  %492 = vmatprep.subr.bf16.mxu0 %v572_v0 }
  0x25   :  { %474 = vmatprep.subr.bf16.mxu1 %v572_v0  ;;  %p550_p11 = por %p549_p10, %p548_p9 }
  0x27   :  { %494 = vmatpush3.bf16.msra.mxu0 %v493_v41  ;;  %p551_p12 = pnand %p550_p11, %p544_p8 }
  0x28   :  { %476 = vmatpush3.bf16.msra.mxu1 %v475_v23  ;;  %495 = vmatprep.subr.bf16.mxu0 %v572_v0 }
  0x29   :  { %477 = vmatprep.subr.bf16.mxu1 %v572_v0 }
  0x2b   :  { %497 = vmatpush3.bf16.msra.mxu0 %v496_v44 }
  0x2c   :  { %479 = vmatpush3.bf16.msra.mxu1 %v478_v26  ;;  %498 = vmatprep.subr.bf16.mxu0 %v572_v0 }
  0x2d   :  { %480 = vmatprep.subr.bf16.mxu1 %v572_v0 }
  0x2f   :  { %500 = vmatpush3.bf16.msra.mxu0 %v499_v47 }
  0x30   :  { %482 = vmatpush3.bf16.msra.mxu1 %v481_v29  ;;  %501 = vmatprep.subr.bf16.mxu0 %v572_v0 }
  0x31   :  { %483 = vmatprep.subr.bf16.mxu1 %v572_v0 }
  0x33   :  { %503 = vmatpush3.bf16.msra.mxu0 %v502_v55 }
  0x34   :  { %485 = vmatpush3.bf16.msra.mxu1 %v484_v32  ;;  %504 = vmatprep.subr.bf16.mxu0 %v572_v0 }
  0x37   :  { %506 = vmatpush3.bf16.msra.mxu0 %v505_v58 }
  0x38   :  { %507 = vmatprep.subr.bf16.mxu0 %v572_v0 }
  0x3b   :  { %509 = vmatpush3.bf16.msra.mxu0 %v508_v61 }
  0xf1   :  { %v123_v49 = vpop.f32.mrb[0].mxu0 }
  0xf2   :  { %v124_v50 = vadd.f32 %v332_v48, %v123_v49  ;;  %v385_v51 = vpop.f32.mrb[1].mxu0 }
  0xf4   :  { %517 = vtanh.f32 %v124_v50 }
  0xfe   :  { %v518_v52 = vpop.eup %517 }
  0xff   :  { %419 = vmatmul.mubr.f32.vlgmr.msra.gmra.mrb[0].mxu1 %v518_v52 }
 0x1d2   :  { %v217_v63 = vpop.f32.mrb[0].mxu1 }
 0x1d3   :  { %v218_v1 = vadd.f32 %v334_v62, %v217_v63  ;;  %v420_v2 = vpop.f32.mrb[1].mxu1 }
 0x1d5   :  { %519 = vtanh.f32 %v218_v1 }
 0x1df   :  { %v520_v3 = vpop.eup %519 }
 0x1e0   :  { %454 = vmatmul.mubr.f32.vlgmr.msra.gmra.mrb[2].mxu0 %v520_v3 }
 0x2b3   :  { %v311_v5 = vpop.f32.mrb[2].mxu0 }
 0x2b4   :  { %v312_v0 = vadd.f32 %v335_v4, %v311_v5  ;;  %v455_v6 = vpop.f32.mrb[3].mxu0 }
 0x2b6   :  { %316 = vst.msk [vmem:[#allocation5] sm:$0xff] %vm315_vm2, %v312_v0 }
 0x2b7   :  { %554 = shalt.err (!%p551_p12)
}
 0x2b8   :  { %s555_s12 = scalar_lea.hbm %s776_s7, 128 }
 0x2b9   :  { %p556_p13 = scmp.ne.s32.totalorder %s776_s7, %s555_s12  ;;  %p559_p0 = scmp.lt.u32.totalorder %s555_s12, %s776_s7 }
 0x2bb   :  { %p561_p1 = pnand %p559_p0, %p556_p13 }
 0x2bd   :  { %564 = shalt.err (!%p561_p1)
}
 0x2be   :  { %326 = dma.vmem_to_hbm [thread:$0]  %s324_s9, 128, %s776_s7, [#allocation4]  }
 0x2bf   :  { %567 = dma.done.wait [#allocation4], 128  }
 0x2c0   :  { %568 = vsyncadd [#allocation4], 4294967168 }
 0x2c1   :  { %330 = vsyncpa [#allocation3], 1 }
 0x2c2   :  { %331 = vsyncpa [#allocation4], 1 }

</bundles_post_ra>
